<compile_context>
chip_gen: v5e
topology: v5e:2x2
jax: 0.10.0
libtpu: 0.0.40
codegen_flags: <defaults>
</compile_context>

<pallas_src>
import jax
import jax.numpy as jnp
from jax.experimental import pallas as pl
from jax.experimental.pallas import tpu as pltpu

B, IN, OUT = 1, 64, 32
ROW_TILE = 256  # row-tile for batched calls (full MXU height on v6e/v7x)


def linear_bias_kernel(x_ref, w_ref, b_ref, o_ref):
    # (tb, IN) @ (IN, OUT) on the MXU, f32 accumulate, fused (pre-offset) bias.
    acc = jnp.dot(x_ref[...], w_ref[...], preferred_element_type=jnp.float32)
    o_ref[...] = (acc + b_ref[...]).astype(o_ref.dtype)


def _linear_small(x, w_t, b_fused):
    # Gridless: whole working set (~tens of KB) lives in VMEM as single blocks.
    b = x.shape[0]
    return pl.pallas_call(
        linear_bias_kernel,
        out_shape=jax.ShapeDtypeStruct((b, OUT), x.dtype),
        in_specs=[
            pl.BlockSpec(memory_space=pltpu.MemorySpace.VMEM),
            pl.BlockSpec(memory_space=pltpu.MemorySpace.VMEM),
            pl.BlockSpec(memory_space=pltpu.MemorySpace.VMEM),
        ],
        out_specs=pl.BlockSpec(memory_space=pltpu.MemorySpace.VMEM),
    )(x, w_t, b_fused)


def _linear_tiled(x, w_t, b_fused, tb):
    # Row-tiled grid; "parallel" lets megacore (v7x 2 TCs) shard the batch.
    b = x.shape[0]  # multiple of tb
    return pl.pallas_call(
        linear_bias_kernel,
        out_shape=jax.ShapeDtypeStruct((b, OUT), x.dtype),
        grid=(b // tb,),
        in_specs=[
            pl.BlockSpec((tb, IN), lambda i: (i, 0)),
            pl.BlockSpec((IN, OUT), lambda i: (0, 0)),
            pl.BlockSpec((1, OUT), lambda i: (0, 0)),
        ],
        out_specs=pl.BlockSpec((tb, OUT), lambda i: (i, 0)),
        compiler_params=pltpu.CompilerParams(dimension_semantics=("parallel",)),
    )(x, w_t, b_fused)


@jax.jit
def forward(x, w_t, b_fused):
    """y = x @ w.T + bias + 0.1 (the +0.1 is pre-folded into b_fused)."""
    batch = x.shape[0]
    if batch >= 2 * ROW_TILE:
        if batch % ROW_TILE == 0:
            return _linear_tiled(x, w_t, b_fused, ROW_TILE)
        bp = pl.cdiv(batch, ROW_TILE) * ROW_TILE
        xp = jnp.zeros((bp, x.shape[1]), x.dtype).at[:batch].set(x)
        return _linear_tiled(xp, w_t, b_fused, ROW_TILE)[:batch]
    # Small batch: one block, no grid, no padding.
    return _linear_small(x, w_t, b_fused)


def prepare_params(w, bias, add_const=0.1):
    """One-time init: transpose weight, fold the +0.1 into the bias."""
    w_t = jnp.asarray(w).T  # (IN, OUT)
    b_fused = (jnp.asarray(bias) + jnp.asarray(add_const, bias.dtype)).reshape(1, -1)
    return w_t, b_fused


if __name__ == "__main__":
    key = jax.random.PRNGKey(0)
    k_x, k_w, k_b, k_big = jax.random.split(key, 4)

    # Input (matches torch.randn(1, 64)).
    x2 = jax.random.normal(k_x, (B, IN), dtype=jnp.float32)

    # Deterministic Linear(64, 32) params (PyTorch-style uniform init range).
    bound = 1.0 / jnp.sqrt(IN)
    w = jax.random.uniform(k_w, (OUT, IN), minval=-bound, maxval=bound,
                           dtype=jnp.float32)  # PyTorch stores (OUT, IN)
    bias = jax.random.uniform(k_b, (OUT,), minval=-bound, maxval=bound,
                              dtype=jnp.float32)

    # Init-time parameter prep (off the per-call hot path).
    w_t, b_fused = prepare_params(w, bias)
    w_t, b_fused = jax.device_put(w_t), jax.device_put(b_fused)

    # --- Spec shape: (1, 64) ------------------------------------------------
    out = forward(x2, w_t, b_fused)
    jax.block_until_ready(out)
    ref = x2 @ w.T + bias + 0.1
    assert out.shape == (B, OUT)
    assert jnp.allclose(out, ref, atol=1e-5, rtol=1e-5), "mismatch vs reference (B=1)"

    # --- Batched path: amortize launch + weight DMA, exercise parallel grid --
    BIG = 512
    x_big = jax.random.normal(k_big, (BIG, IN), dtype=jnp.float32)
    out_big = forward(x_big, w_t, b_fused)
    jax.block_until_ready(out_big)
    ref_big = x_big @ w.T + bias + 0.1
    assert out_big.shape == (BIG, OUT)
    assert jnp.allclose(out_big, ref_big, atol=1e-5, rtol=1e-5), \
        "mismatch vs reference (B=512)"

    print("KERNEL_OK")
</pallas_src>

<mosaic_0001>
module attributes {stable_mosaic.version = 11 : i64} {
  func.func @linear_bias_kernel(%arg0: memref<1x64xf32, #tpu.memory_space<vmem>>, %arg1: memref<64x32xf32, #tpu.memory_space<vmem>>, %arg2: memref<1x32xf32, #tpu.memory_space<vmem>>, %arg3: memref<1x32xf32, #tpu.memory_space<vmem>>) attributes {dimension_semantics = [], scalar_prefetch = 0 : i64, scratch_operands = 0 : i64, tpu.core_type = #tpu.core_type<tc>} {
    %c0 = arith.constant 0 : index
    %c0_0 = arith.constant 0 : index
    %0 = vector.load %arg0[%c0, %c0_0] : memref<1x64xf32, #tpu.memory_space<vmem>>, vector<1x64xf32>
    %c0_1 = arith.constant 0 : index
    %c0_2 = arith.constant 0 : index
    %1 = vector.load %arg1[%c0_1, %c0_2] : memref<64x32xf32, #tpu.memory_space<vmem>>, vector<64x32xf32>
    %cst = arith.constant dense<0.000000e+00> : vector<1x32xf32>
    %2 = tpu.matmul %0, %1, %cst {dimension_numbers = #tpu.dot_dimension_numbers<[1], [0], [0], [1], [0, 0, 1, 1], [], []>} : vector<1x64xf32>, vector<64x32xf32>, vector<1x32xf32> -> vector<1x32xf32>
    %c0_3 = arith.constant 0 : index
    %c0_4 = arith.constant 0 : index
    %3 = vector.load %arg2[%c0_3, %c0_4] : memref<1x32xf32, #tpu.memory_space<vmem>>, vector<1x32xf32>
    %4 = arith.addf %2, %3 : vector<1x32xf32>
    %c0_5 = arith.constant 0 : index
    %c0_6 = arith.constant 0 : index
    %5 = vector.load %arg3[%c0_5, %c0_6] : memref<1x32xf32, #tpu.memory_space<vmem>>, vector<1x32xf32>
    tpu.vector_store %arg3[%c0_5, %c0_6], %4 {strides = array<i32>} : memref<1x32xf32, #tpu.memory_space<vmem>>, vector<1x32xf32>,
    return
  }
}

</mosaic_0001>

<bundles_post_ra>
// kernel: forward.1
= control target key start
LH: loop header
LB: loop body
LE: loop exit
PB: predicated region body
PF: predicated region fallthrough
CT: control target
= control target key end

     0   :  { %s149_s0 = inlined_call_operand.vmem [shape: f32[1,64], index: 0, kind: input, shape index: {}]   ;;  %s150_s1 = inlined_call_operand.vmem [shape: f32[64,32], index: 1, kind: input, shape index: {}]   ;;  %s151_s2 = inlined_call_operand.vmem [shape: f32[1,32], index: 2, kind: input, shape index: {}]   ;;  %s152_s3 = inlined_call_operand.hbm [shape: f32[1,32], index: 3, kind: output, shape index: {}]  }
   0x1   :  { %v23_v0 = vld [vmem:[%s150_s1 + $0x38] sm:$0xff]  ;;  %v22_v1 = vld [vmem:[%s150_s1 + $0x30] sm:$0xff]  ;;  %v21_v2 = vld [vmem:[%s150_s1 + $0x28] sm:$0xff] }
   0x2   :  { %37 = vmatpush.msra.mxu0 %v23_v0 }
   0x4   :  { %38 = vmatpush.msra.mxu0 %v22_v1 }
   0x5   :  { %8 = vsyncpa [#allocation3], 0  ;;  %v20_v3 = vld [vmem:[%s150_s1 + $0x20] sm:$0xff]  ;;  %v19_v4 = vld [vmem:[%s150_s1 + $0x18] sm:$0xff]  ;;  %vm25_vm0 = vcmask 523264   ;;  %s95_s5 = smov [#allocation2]  }
   0x6   :  { %39 = vmatpush.msra.mxu0 %v21_v2  ;;  %v18_v5 = vld [vmem:[%s150_s1 + $0x10] sm:$0xff]  ;;  %v17_v6 = vld [vmem:[%s150_s1 + $0x8] sm:$0xff]  ;;  %v16_v7 = vld [vmem:[%s150_s1] sm:$0xff]  ;;  %s56_s6 = sshll.u32 %s95_s5, 4  ;;  %s58_s9 = sshll.u32 %s152_s3, 4  ;;  %vm49_vm1 = vcmask 253952   ;;  %s57_s6 = int_to_ptr.vmem [resolvable:$true] %s56_s6  ;;  %s59_s9 = int_to_ptr.hbm [resolvable:$true] %s58_s9 }
   0x7   :  { %v15_v8 = vld [vmem:[%s149_s0] sm:$0x1] }
   0x8   :  { %40 = vmatpush.msra.mxu0 %v20_v3  ;;  %v24_v9 = vld [vmem:[%s151_s2] sm:$0x1] }
   0xa   :  { %41 = vmatpush.msra.mxu0 %v19_v4 }
   0xc   :  { %42 = vmatpush.msra.mxu0 %v18_v5 }
   0xe   :  { %43 = vmatpush.msra.mxu0 %v17_v6 }
  0x10   :  { %44 = vmatpush.msra.mxu0 %v16_v7 }
  0x11   :  { %67 = vmatmul.msk.f32.vlgmr.msra.gmra.mxu0 %vm25_vm0, %v15_v8 }
  0x8e   :  { %v46_v10 = vpop.f32.mrf.mxu0 }
  0x8f   :  { %v47_v11 = vadd.f32 %v46_v10, %v24_v9 }
  0x91   :  { %50 = vst.msk [vmem:[#allocation2] sm:$0x1] %vm49_vm1, %v47_v11 }
  0x92   :  { %61 = dma.vmem_to_hbm [thread:$0]  %s57_s6, 16, %s59_s9, [#allocation3]  }
  0x93   :  { %93 = dma.done.wait [#allocation3], 16  }
  0x94   :  { %94 = vsyncadd [#allocation3], 4294967280 }
  0x95   :  { %66 = vsyncpa [#allocation3], 1 }

</bundles_post_ra>
